<compile_context>
chip_gen: v7x
topology: tpu7x:2x2x1
jax: 0.10.0
libtpu: 0.0.40
codegen_flags: <defaults>
</compile_context>

<pallas_src>
import jax
import jax.numpy as jnp
from jax.experimental import pallas as pl
from jax.experimental.pallas import tpu as pltpu

_LANES = 128


def _laplacian_kernel(ninv_ref, x_ref, o_ref):
    # ninv_ref: (1,) f32 scalar (= -1/a) in SMEM; x_ref/o_ref: (tr, 128) tiles
    # kept in the input dtype. Compute in f32, cast back on store.
    ninv = ninv_ref[0]
    x = x_ref[...].astype(jnp.float32)
    y = jnp.exp(jnp.abs(x) * ninv)            # abs/mul on VPU, exp on EUP slot
    o_ref[...] = y.astype(o_ref.dtype)


def _sublane_quantum(dtype):
    # Minimum second-minor tile multiple: f32 -> 8, bf16/f16 -> 16, int8/fp8 -> 32.
    return max(8, 32 // max(jnp.dtype(dtype).itemsize, 1))


def _round_up(x, m):
    return ((x + m - 1) // m) * m


def _default_tile_rows():
    # Generation-aware default tile (rows of 128 lanes).
    try:
        kind = jax.devices()[0].device_kind.lower()
    except Exception:
        return 8192
    if "v7" in kind or "7x" in kind:
        return 16384          # 8 MiB f32 buffers: per-step overhead ~6% at 3.2 TB/s
    if "v6" in kind or "v5p" in kind:
        return 8192           # 4 MiB
    if "v5" in kind:
        return 4096           # 2 MiB is already ~5 us/step at ~820 GB/s
    return 8192


def _run_tiles(x2d, neg_inv_a, tile_rows):
    rows, lanes = x2d.shape
    sub = _sublane_quantum(x2d.dtype)

    # Aim for >= 4 grid steps (pipelining + v7x megacore sharding) but never
    # drop below ~512 rows per tile, capped at the per-generation tile size.
    quarter = _round_up(pl.cdiv(rows, 4), sub)
    tr = min(tile_rows, max(512, quarter))
    tr = _round_up(tr, sub)
    if tr >= rows:
        tr = rows             # single full-extent block (always a legal tile)

    grid = (pl.cdiv(rows, tr),)
    return pl.pallas_call(
        _laplacian_kernel,
        out_shape=jax.ShapeDtypeStruct((rows, lanes), x2d.dtype),
        grid=grid,
        in_specs=[
            pl.BlockSpec(memory_space=pltpu.SMEM),           # -1/a scalar
            pl.BlockSpec((tr, lanes), lambda i: (i, 0)),     # x tile
        ],
        out_specs=pl.BlockSpec((tr, lanes), lambda i: (i, 0)),
        compiler_params=pltpu.CompilerParams(
            dimension_semantics=("parallel",),
            vmem_limit_bytes=40 * 1024 * 1024,
        ),
    )(neg_inv_a, x2d)


def laplacian_activation(x, a, *, tile_rows=None):
    """Elementwise exp(-|x| / a). x: any shape/dtype, a: shape (1,) parameter."""
    # TODO(synk): only the forward pass is implemented; the trainable parameter
    # 'a' (nn.Parameter registration / autograd) is handled outside the kernel.
    orig_shape = x.shape
    orig_dtype = x.dtype
    if tile_rows is None:
        tile_rows = _default_tile_rows()

    neg_inv_a = (-1.0 / a.astype(jnp.float32)).reshape(1)

    n = x.size
    if n == 0:
        return x
    flat = x.reshape(-1)

    # Stream the 128-aligned prefix through the kernel; no pad / no bulk slice.
    n_main = (n // _LANES) * _LANES
    outs = []
    if n_main > 0:
        prefix = flat if n_main == n else flat[:n_main]
        x2d = prefix.reshape(n_main // _LANES, _LANES)
        outs.append(_run_tiles(x2d, neg_inv_a, tile_rows).reshape(-1))
    if n_main != n:
        # <128-element tail: plain jnp epilogue (negligible traffic).
        tail = flat[n_main:]
        tail_y = jnp.exp(jnp.abs(tail).astype(jnp.float32) * neg_inv_a[0])
        outs.append(tail_y.astype(orig_dtype))

    out_flat = outs[0] if len(outs) == 1 else jnp.concatenate(outs)
    return out_flat.reshape(orig_shape)


if __name__ == "__main__":
    key = jax.random.PRNGKey(0)
    # Mirrors LaplacianActivation.__init__(a=1.0): parameter 'a' of shape (1,)
    a = jnp.ones((1,), dtype=jnp.float32)

    # f32, lane-aligned conv-style activation (2*4*16*16 = 2048 elements)
    x = jax.random.normal(key, (2, 4, 16, 16), dtype=jnp.float32)
    y = jax.block_until_ready(laplacian_activation(x, a))
    ref = jnp.exp(-jnp.abs(x) / a[0])
    assert y.shape == x.shape and y.dtype == x.dtype
    assert jnp.allclose(y, ref, rtol=1e-5, atol=1e-6)

    # bf16 path: streams bf16 end-to-end, computes in f32, casts on store
    xb = x.astype(jnp.bfloat16)
    yb = jax.block_until_ready(laplacian_activation(xb, a))
    refb = jnp.exp(-jnp.abs(xb.astype(jnp.float32)) / a[0]).astype(jnp.bfloat16)
    assert yb.shape == xb.shape and yb.dtype == jnp.bfloat16
    assert jnp.allclose(yb.astype(jnp.float32), refb.astype(jnp.float32),
                        rtol=2e-2, atol=2e-2)

    # non-128-aligned size: kernel on aligned prefix + tiny jnp tail (no pad)
    xu = jax.random.normal(jax.random.PRNGKey(1), (3, 7, 31), dtype=jnp.float32)
    yu = jax.block_until_ready(laplacian_activation(xu, a))
    refu = jnp.exp(-jnp.abs(xu) / a[0])
    assert yu.shape == xu.shape and yu.dtype == xu.dtype
    assert jnp.allclose(yu, refu, rtol=1e-5, atol=1e-6)

    print("KERNEL_OK")
</pallas_src>

<mosaic_0001>
module attributes {stable_mosaic.version = 11 : i64} {
  func.func @_laplacian_kernel(%arg0: i32, %arg1: memref<1xf32, #tpu.memory_space<smem>>, %arg2: memref<16x128xf32, #tpu.memory_space<vmem>>, %arg3: memref<16x128xf32, #tpu.memory_space<vmem>>) attributes {dimension_semantics = [#tpu.dimension_semantics<parallel>], iteration_bounds = array<i64: 1>, scalar_prefetch = 0 : i64, scratch_operands = 0 : i64, tpu.core_type = #tpu.core_type<tc>, window_params = [{transform_indices = @transform_0, window_bounds = array<i64: 1>}, {transform_indices = @transform_1, window_bounds = array<i64: 16, 128>}, {transform_indices = @transform_2, window_bounds = array<i64: 16, 128>}]} {
    %c0 = arith.constant 0 : index
    %0 = memref.load %arg1[%c0] : memref<1xf32, #tpu.memory_space<smem>>
    %c0_0 = arith.constant 0 : index
    %c0_1 = arith.constant 0 : index
    %1 = vector.load %arg2[%c0_0, %c0_1] : memref<16x128xf32, #tpu.memory_space<vmem>>, vector<16x128xf32>
    %2 = math.absf %1 : vector<16x128xf32>
    %3 = vector.broadcast %0 : f32 to vector<16x128xf32>
    %4 = arith.mulf %2, %3 : vector<16x128xf32>
    %5 = math.exp %4 : vector<16x128xf32>
    %c0_2 = arith.constant 0 : index
    %c0_3 = arith.constant 0 : index
    %6 = vector.load %arg3[%c0_2, %c0_3] : memref<16x128xf32, #tpu.memory_space<vmem>>, vector<16x128xf32>
    tpu.vector_store %arg3[%c0_2, %c0_3], %5 {strides = array<i32>} : memref<16x128xf32, #tpu.memory_space<vmem>>, vector<16x128xf32>,
    return
  }
  func.func @transform_0(%arg0: i32) -> i32 {
    %c0_i32 = arith.constant 0 : i32
    %c0_i32_0 = arith.constant 0 : i32
    return %c0_i32 : i32
  }
  func.func @transform_1(%arg0: i32) -> (i32, i32) {
    %c0_i32 = arith.constant 0 : i32
    %c0_i32_0 = arith.constant 0 : i32
    return %arg0, %c0_i32 : i32, i32
  }
  func.func @transform_2(%arg0: i32) -> (i32, i32) {
    %c0_i32 = arith.constant 0 : i32
    %c0_i32_0 = arith.constant 0 : i32
    return %arg0, %c0_i32 : i32, i32
  }
}

</mosaic_0001>

<bundles_post_ra>
// kernel: tpu_custom_call.1
= control target key start
LH: loop header
LB: loop body
LE: loop exit
PB: predicated region body
PF: predicated region fallthrough
CT: control target
= control target key end

     0   :  { %8 = vsyncpa [#allocation4], 0  ;;  %s166_s0 = inlined_call_operand.<no memory space> [shape: f32[1], index: 0, kind: input, shape index: {}]   ;;  %s167_s1 = inlined_call_operand.hbm [shape: f32[16,128], index: 1, kind: input, shape index: {}]   ;;  %s168_s2 = inlined_call_operand.hbm [shape: f32[16,128], index: 2, kind: output, shape index: {}]  }
   0x1   :  { %9 = vsyncpa [#allocation5], 0  ;;  %s114_s9 = smov [#allocation3]   ;;  %s66_s13 = scalar_lea.hbm %s167_s1, 256 }
   0x2   :  { %s17_s10 = sshll.u32 %s114_s9, 4  ;;  %p67_p0 = scmp.ne.s32.totalorder %s167_s1, %s66_s13  ;;  %s18_s10 = int_to_ptr.vmem [resolvable:$true] %s17_s10 }
   0x3   :  { %p70_p1 = scmp.lt.u32.totalorder %s66_s13, %s167_s1 }
   0x5   :  { %p72_p2 = pnand %p70_p1, %p67_p0 }
   0x7   :  { %75 = shalt.err (!%p72_p2)
}
   0x8   :  { %s76_s18 = scalar_lea.vmem %s18_s10, 256  ;;  %p81_p4 = scmp.lt.s32.totalorder %s18_s10, %s18_s10 }
   0x9   :  { %p77_p3 = scmp.ne.s32.totalorder %s18_s10, %s76_s18  ;;  %p82_p5 = scmp.lt.s32.totalorder %s76_s18, %s76_s18 }
   0xb   :  { %p83_p6 = por %p82_p5, %p81_p4 }
   0xd   :  { %p84_p7 = pnand %p83_p6, %p77_p3 }
   0xf   :  { %87 = shalt.err (!%p84_p7)
}
  0x10   :  { %s115_s19 = smov 128   ;;  %s116_s20 = smov 8  }
  0x11   :  { %23 = dma.hbm_to_vmem [thread:$0]  %s167_s1, 256, %s18_s10, [#allocation4], %s115_s19, %s115_s19, %s116_s20  }
  0x12   :  { %110 = dma.done.wait [#allocation4], 256  }
  0x13   :  { %111 = vsyncadd [#allocation4], 4294967040  ;;  %v28_v0 = vld [vmem:[#allocation3] sm:$0xff]  ;;  %v32_v1 = vstv %s166_s0  ;;  %v29_v2 = vld [vmem:[#allocation3 + $0x8] sm:$0xff]  ;;  %s117_s25 = smov [#allocation6]  }
  0x14   :  { %v30_v3 = vand.u32 2147483647, %v28_v0  ;;  %v31_v4 = vand.u32 2147483647, %v29_v2  ;;  %s46_s26 = sshll.u32 %s117_s25, 4  ;;  %s47_s26 = int_to_ptr.vmem [resolvable:$true] %s46_s26 }
  0x15   :  { %s88_s1 = scalar_lea.vmem %s47_s26, 256  ;;  %p93_p9 = scmp.lt.s32.totalorder %s47_s26, %s47_s26 }
  0x16   :  { %v33_v5 = vmul.f32 %v32_v1, %v30_v3  ;;  %v34_v6 = vmul.f32 %v32_v1, %v31_v4  ;;  %p89_p8 = scmp.ne.s32.totalorder %s47_s26, %s88_s1  ;;  %p94_p10 = scmp.lt.s32.totalorder %s88_s1, %s88_s1 }
  0x18   :  { %v35_v7 = vmul.f32 1.442695, %v33_v5  ;;  %v37_v8 = vmul.f32 1.442695, %v34_v6  ;;  %p95_p11 = por %p94_p10, %p93_p9 }
  0x1a   :  { %62 = vpow2.f32 %v35_v7  ;;  %p96_p12 = pnand %p95_p11, %p89_p8 }
  0x1b   :  { %64 = vpow2.f32 %v37_v8 }
  0x24   :  { %v63_v9 = vpop.eup %62 }
  0x25   :  { %v65_v10 = vpop.eup %64  ;;  %39 = vst [vmem:[#allocation6] sm:$0xff] %v63_v9 }
  0x26   :  { %40 = vst [vmem:[#allocation6 + $0x8] sm:$0xff] %v65_v10 }
  0x27   :  { %99 = shalt.err (!%p96_p12)
}
  0x28   :  { %s100_s28 = scalar_lea.hbm %s168_s2, 256 }
  0x29   :  { %p101_p13 = scmp.ne.s32.totalorder %s168_s2, %s100_s28  ;;  %p104_p0 = scmp.lt.u32.totalorder %s100_s28, %s168_s2 }
  0x2b   :  { %p106_p1 = pnand %p104_p0, %p101_p13 }
  0x2d   :  { %109 = shalt.err (!%p106_p1)
}
  0x2e   :  { %52 = dma.vmem_to_hbm [thread:$0]  %s47_s26, 256, %s168_s2, [#allocation5], %s115_s19, %s115_s19, %s116_s20  }
  0x2f   :  { %112 = dma.done.wait [#allocation5], 256  }
  0x30   :  { %113 = vsyncadd [#allocation5], 4294967040 }
  0x31   :  { %56 = vsyncpa [#allocation4], 1 }
  0x32   :  { %57 = vsyncpa [#allocation5], 1 }

</bundles_post_ra>
